<compile_context>
chip_gen: v7x
topology: tpu7x:2x2x1
jax: 0.10.0
libtpu: 0.0.40
codegen_flags: <defaults>
</compile_context>

<pallas_src>
import jax
import jax.numpy as jnp
from jax.experimental import pallas as pl
from jax.experimental.pallas import tpu as pltpu

NEG_SLOPE = 0.01            # F.leaky_relu default negative_slope
_LANE = 128
_MAX_NB = 8                 # max images batched per grid step (unrolled loop)
_SMALL_C = 4                # <= this -> unrolled VPU MACs instead of MXU dot
_BUFFERED1_MIN_C = 256      # apply pl.Buffered(1) to resident weights above this
_BF16_MXU_MIN_C = 256       # cast f32 matmul operands to bf16 above this


def _round_up(x, m):
    return ((x + m - 1) // m) * m


def _cdiv(a, b):
    return -(-a // b)


def _leaky_relu(x):
    return jnp.where(x > 0, x, NEG_SLOPE * x)


def _vmem_budget_and_limit():
    """Generation-aware scoped-VMEM limit and planning budget."""
    try:
        cap = int(pltpu.get_tpu_info().vmem_capacity_bytes)
    except Exception:
        cap = 64 * 1024 * 1024                    # conservative (v7x per-core VMEM)
    limit = min(cap // 2, 64 * 1024 * 1024)       # ~32 MiB v7x, ~64 MiB v5e/v6e
    budget = int(limit * 0.85)                    # headroom for Mosaic scratch
    return budget, limit


def _plan_blocks(N, C, HW, itemsize, budget):
    """Pick (images per step, spatial tile) under the VMEM budget."""
    sub = {4: 8, 2: 16, 1: 32}.get(itemsize, 8)
    c_sub = _round_up(C, sub)        # sublane-padded C at activation dtype
    c_sub32 = _round_up(C, 8)        # sublane-padded C at f32
    c_lane = _round_up(C, 128)

    # Resident weights/biases (double-buffered unless Buffered(1) applies).
    wbuf = 1 if C >= _BUFFERED1_MIN_C else 2
    fixed = wbuf * 2 * (c_sub * c_lane * itemsize      # w1, w2
                        + c_sub32 * _LANE * 4)         # b1, b2 (f32)

    # Per spatial column: double-buffered input + output blocks at the
    # activation dtype, plus ~3 f32 intermediates the kernel body materializes.
    per_col = c_sub * 4 * itemsize + c_sub32 * 3 * 4

    avail = max(budget - fixed, per_col * _LANE)
    max_cols = avail // per_col                        # bound on Nb * tile_hw

    hw128 = _round_up(HW, _LANE)
    # Balanced spatial tiles, multiple of 128, under the budget.
    max_tile = max(_LANE, (min(max_cols, hw128) // _LANE) * _LANE)
    n_hw = _cdiv(hw128, max_tile)
    tile_hw = _round_up(_cdiv(hw128, n_hw), _LANE)

    # Batch images per step only when a whole image's spatial extent fits in
    # one tile; nb must divide N (avoids partial leading-dim blocks).
    nb = 1
    if _cdiv(HW, tile_hw) == 1 and N > 1:
        cap = int(min(N, _MAX_NB, max(1, max_cols // tile_hw)))
        for d in range(cap, 0, -1):
            if N % d == 0:
                nb = d
                break

    # Keep >= 2 grid steps so megacore (v7x) can shard the work.
    def steps(nb_, tile_):
        return (N // nb_) * _cdiv(HW, tile_)

    if steps(nb, tile_hw) < 2:
        if nb > 1:
            for d in range(min(nb, N // 2), 0, -1):
                if N % d == 0:
                    nb = d
                    break
        if steps(nb, tile_hw) < 2 and hw128 > _LANE:
            tile_hw = _round_up(_cdiv(hw128, 2), _LANE)

    return nb, tile_hw


def _make_kernel(C, nb, use_macs, bf16_mxu):
    """Fused resblock kernel for an (nb, C, TILE_HW) tile."""

    def conv1x1(w, b, x):
        if use_macs:
            # Tiny C: unrolled VPU broadcast-MACs (HBM-bound regardless).
            xf = x.astype(jnp.float32)
            wf = w.astype(jnp.float32)
            acc = wf[:, 0:1] * xf[0:1, :]
            for ci in range(1, C):
                acc = acc + wf[:, ci:ci + 1] * xf[ci:ci + 1, :]
            return acc + b
        lhs, rhs = w, x
        if bf16_mxu:
            lhs = lhs.astype(jnp.bfloat16)
            rhs = rhs.astype(jnp.bfloat16)
        return jnp.dot(lhs, rhs, preferred_element_type=jnp.float32) + b

    def kernel(x_ref, w1_ref, b1_ref, w2_ref, b2_ref, o_ref):
        w1 = w1_ref[...]
        b1 = b1_ref[...]
        w2 = w2_ref[...]
        b2 = b2_ref[...]
        for i in range(nb):                                  # static, unrolled
            x = x_ref[i]                                     # (C, TILE_HW)
            h = _leaky_relu(conv1x1(w1, b1, x))              # f32
            h = _leaky_relu(conv1x1(w2, b2, h.astype(x.dtype)))
            # Residual keeps x at its original precision (exact for f32 input).
            o_ref[i] = (h + x.astype(jnp.float32)).astype(o_ref.dtype)

    return kernel


def resnet_block_forward(x_nchw, w1, b1, w2, b2, *, bf16_mxu=None):
    """Fused ResNetBlock forward: lrelu(conv2(lrelu(conv1(x)))) + x.

    x_nchw: [N, C, H, W] (f32 or bf16; the kernel runs in this dtype end-to-end,
    so feeding bf16 truly halves HBM traffic -- no wrapper-side casts).
    w1/w2: [C, C] (PyTorch Conv2d 1x1 weight with the trailing 1x1 dims squeezed,
    i.e. weight[:, :, 0, 0]).  b1/b2: [C].
    bf16_mxu: cast matmul operands to bf16 in-kernel (f32 accumulation, f32
    residual); auto-enabled for f32 inputs with C >= 256 (keeps v5e HBM-bound).
    """
    N, C, H, W = x_nchw.shape
    HW = H * W
    act_dtype = x_nchw.dtype
    itemsize = jnp.dtype(act_dtype).itemsize

    if bf16_mxu is None:
        bf16_mxu = (C >= _BF16_MXU_MIN_C
                    and jnp.dtype(act_dtype) == jnp.dtype(jnp.float32))

    # NCHW -> [N, C, HW]: pure reshape, no transpose, no dtype cast, no pad.
    x_flat = x_nchw.reshape(N, C, HW)
    w1_c = jnp.asarray(w1, act_dtype)
    w2_c = jnp.asarray(w2, act_dtype)
    b1_c = jnp.asarray(b1, jnp.float32).reshape(C, 1)
    b2_c = jnp.asarray(b2, jnp.float32).reshape(C, 1)

    budget, vmem_limit = _vmem_budget_and_limit()
    nb, tile_hw = _plan_blocks(N, C, HW, itemsize, budget)
    grid = (N // nb, _cdiv(HW, tile_hw))          # partial last HW tile is masked

    kernel = _make_kernel(C, nb, use_macs=(C <= _SMALL_C), bf16_mxu=bf16_mxu)

    # Constant-index (resident) operands: drop the pipeline double buffer once
    # it would waste meaningful VMEM (only matters for large C).
    w_kwargs = {}
    if C >= _BUFFERED1_MIN_C:
        w_kwargs = dict(pipeline_mode=pl.Buffered(1))

    out_flat = pl.pallas_call(
        kernel,
        out_shape=jax.ShapeDtypeStruct((N, C, HW), act_dtype),
        grid_spec=pltpu.PrefetchScalarGridSpec(
            num_scalar_prefetch=0,
            grid=grid,
            in_specs=[
                pl.BlockSpec((nb, C, tile_hw), lambda n, j: (n, 0, j)),   # x
                pl.BlockSpec((C, C), lambda n, j: (0, 0), **w_kwargs),    # w1
                pl.BlockSpec((C, 1), lambda n, j: (0, 0), **w_kwargs),    # b1
                pl.BlockSpec((C, C), lambda n, j: (0, 0), **w_kwargs),    # w2
                pl.BlockSpec((C, 1), lambda n, j: (0, 0), **w_kwargs),    # b2
            ],
            out_specs=pl.BlockSpec((nb, C, tile_hw), lambda n, j: (n, 0, j)),
        ),
        compiler_params=pltpu.CompilerParams(
            dimension_semantics=("parallel", "parallel"),
            vmem_limit_bytes=vmem_limit,
        ),
    )(x_flat, w1_c, b1_c, w2_c, b2_c)

    return out_flat.reshape(N, C, H, W)


def _reference(x_nchw, w1, b1, w2, b2):
    # Pure-JAX reference of the PyTorch forward (1x1 convs as einsums).
    def conv1x1(x, w, b):
        return jnp.einsum("nchw,oc->nohw", x, w) + b[None, :, None, None]
    h = jax.nn.leaky_relu(conv1x1(x_nchw, w1, b1), NEG_SLOPE)
    h = jax.nn.leaky_relu(conv1x1(h, w2, b2), NEG_SLOPE)
    return h + x_nchw


def _run_case(key, N, C, H, W, atol):
    kx, kw1, kb1, kw2, kb2 = jax.random.split(key, 5)
    x = jax.random.normal(kx, (N, C, H, W), dtype=jnp.float32)
    w1 = jax.random.normal(kw1, (C, C), dtype=jnp.float32) * 0.5
    b1 = jax.random.normal(kb1, (C,), dtype=jnp.float32) * 0.1
    w2 = jax.random.normal(kw2, (C, C), dtype=jnp.float32) * 0.5
    b2 = jax.random.normal(kb2, (C,), dtype=jnp.float32) * 0.1

    out = jax.block_until_ready(resnet_block_forward(x, w1, b1, w2, b2))
    ref = _reference(x, w1, b1, w2, b2)
    assert out.shape == (N, C, H, W)
    err = float(jnp.max(jnp.abs(out - ref)))
    assert jnp.allclose(out, ref, atol=atol, rtol=atol), err
    return out


if __name__ == "__main__":
    key = jax.random.PRNGKey(0)
    k0, k1, k2, k3 = jax.random.split(key, 4)

    # Main case (module's typical small shapes): VPU-MAC path, grid (2, 1).
    _run_case(k0, N=2, C=4, H=16, W=16, atol=1e-5)
    # Ragged spatial extent (HW=100): masked partial lane tile, MXU dot at C=8.
    _run_case(k1, N=1, C=8, H=10, W=10, atol=1e-4)
    # Single image, larger C: spatial split for >=2 grid steps, MXU path.
    _run_case(k2, N=1, C=32, H=12, W=12, atol=2e-4)
    # Several small images: Nb>1 images batched per grid step (unrolled loop).
    _run_case(k3, N=4, C=64, H=32, W=32, atol=1e-3)

    print("KERNEL_OK")
</pallas_src>

<mosaic_0001>
module attributes {stable_mosaic.version = 11 : i64} {
  func.func @kernel(%arg0: i32, %arg1: i32, %arg2: memref<1x4x256xf32, #tpu.memory_space<vmem>>, %arg3: memref<4x4xf32, #tpu.memory_space<vmem>>, %arg4: memref<4x1xf32, #tpu.memory_space<vmem>>, %arg5: memref<4x4xf32, #tpu.memory_space<vmem>>, %arg6: memref<4x1xf32, #tpu.memory_space<vmem>>, %arg7: memref<1x4x256xf32, #tpu.memory_space<vmem>>) attributes {dimension_semantics = [#tpu.dimension_semantics<parallel>, #tpu.dimension_semantics<parallel>], iteration_bounds = array<i64: 2, 1>, scalar_prefetch = 0 : i64, scratch_operands = 0 : i64, tpu.core_type = #tpu.core_type<tc>, window_params = [{transform_indices = @transform_0, window_bounds = array<i64: 1, 4, 256>}, {pipeline_mode = #tpu.pipeline_mode<synchronous>, transform_indices = @transform_1, window_bounds = array<i64: 4, 4>}, {pipeline_mode = #tpu.pipeline_mode<synchronous>, transform_indices = @transform_2, window_bounds = array<i64: 4, 1>}, {pipeline_mode = #tpu.pipeline_mode<synchronous>, transform_indices = @transform_3, window_bounds = array<i64: 4, 4>}, {pipeline_mode = #tpu.pipeline_mode<synchronous>, transform_indices = @transform_4, window_bounds = array<i64: 4, 1>}, {transform_indices = @transform_5, window_bounds = array<i64: 1, 4, 256>}]} {
    %c0 = arith.constant 0 : index
    %c0_0 = arith.constant 0 : index
    %0 = vector.load %arg3[%c0, %c0_0] : memref<4x4xf32, #tpu.memory_space<vmem>>, vector<4x4xf32>
    %c0_1 = arith.constant 0 : index
    %c0_2 = arith.constant 0 : index
    %1 = vector.load %arg4[%c0_1, %c0_2] : memref<4x1xf32, #tpu.memory_space<vmem>>, vector<4x1xf32>
    %c0_3 = arith.constant 0 : index
    %c0_4 = arith.constant 0 : index
    %2 = vector.load %arg5[%c0_3, %c0_4] : memref<4x4xf32, #tpu.memory_space<vmem>>, vector<4x4xf32>
    %c0_5 = arith.constant 0 : index
    %c0_6 = arith.constant 0 : index
    %3 = vector.load %arg6[%c0_5, %c0_6] : memref<4x1xf32, #tpu.memory_space<vmem>>, vector<4x1xf32>
    %c0_7 = arith.constant 0 : index
    %c0_8 = arith.constant 0 : index
    %c0_9 = arith.constant 0 : index
    %4 = vector.load %arg2[%c0_7, %c0_8, %c0_9] : memref<1x4x256xf32, #tpu.memory_space<vmem>>, vector<1x4x256xf32>
    %5 = vector.shape_cast %4 : vector<1x4x256xf32> to vector<4x256xf32>
    %6 = vector.extract_strided_slice %0 {offsets = [0, 0], sizes = [4, 1], strides = [1, 1]} : vector<4x4xf32> to vector<4x1xf32>
    %7 = vector.extract_strided_slice %5 {offsets = [0, 0], sizes = [1, 256], strides = [1, 1]} : vector<4x256xf32> to vector<1x256xf32>
    %8 = vector.broadcast %6 : vector<4x1xf32> to vector<4x256xf32>
    %9 = vector.broadcast %7 : vector<1x256xf32> to vector<4x256xf32>
    %10 = arith.mulf %8, %9 : vector<4x256xf32>
    %11 = vector.extract_strided_slice %0 {offsets = [0, 1], sizes = [4, 1], strides = [1, 1]} : vector<4x4xf32> to vector<4x1xf32>
    %12 = vector.extract_strided_slice %5 {offsets = [1, 0], sizes = [1, 256], strides = [1, 1]} : vector<4x256xf32> to vector<1x256xf32>
    %13 = vector.broadcast %11 : vector<4x1xf32> to vector<4x256xf32>
    %14 = vector.broadcast %12 : vector<1x256xf32> to vector<4x256xf32>
    %15 = arith.mulf %13, %14 : vector<4x256xf32>
    %16 = arith.addf %10, %15 : vector<4x256xf32>
    %17 = vector.extract_strided_slice %0 {offsets = [0, 2], sizes = [4, 1], strides = [1, 1]} : vector<4x4xf32> to vector<4x1xf32>
    %18 = vector.extract_strided_slice %5 {offsets = [2, 0], sizes = [1, 256], strides = [1, 1]} : vector<4x256xf32> to vector<1x256xf32>
    %19 = vector.broadcast %17 : vector<4x1xf32> to vector<4x256xf32>
    %20 = vector.broadcast %18 : vector<1x256xf32> to vector<4x256xf32>
    %21 = arith.mulf %19, %20 : vector<4x256xf32>
    %22 = arith.addf %16, %21 : vector<4x256xf32>
    %23 = vector.extract_strided_slice %0 {offsets = [0, 3], sizes = [4, 1], strides = [1, 1]} : vector<4x4xf32> to vector<4x1xf32>
    %24 = vector.extract_strided_slice %5 {offsets = [3, 0], sizes = [1, 256], strides = [1, 1]} : vector<4x256xf32> to vector<1x256xf32>
    %25 = vector.broadcast %23 : vector<4x1xf32> to vector<4x256xf32>
    %26 = vector.broadcast %24 : vector<1x256xf32> to vector<4x256xf32>
    %27 = arith.mulf %25, %26 : vector<4x256xf32>
    %28 = arith.addf %22, %27 : vector<4x256xf32>
    %29 = vector.broadcast %1 : vector<4x1xf32> to vector<4x256xf32>
    %30 = arith.addf %28, %29 : vector<4x256xf32>
    %cst = arith.constant 0.000000e+00 : f32
    %31 = vector.broadcast %cst : f32 to vector<4x256xf32>
    %32 = arith.cmpf ogt, %30, %31 : vector<4x256xf32>
    %cst_10 = arith.constant 0.00999999977 : f32
    %33 = vector.broadcast %cst_10 : f32 to vector<4x256xf32>
    %34 = arith.mulf %33, %30 : vector<4x256xf32>
    %35 = arith.select %32, %30, %34 : vector<4x256xi1>, vector<4x256xf32>
    %36 = vector.extract_strided_slice %2 {offsets = [0, 0], sizes = [4, 1], strides = [1, 1]} : vector<4x4xf32> to vector<4x1xf32>
    %37 = vector.extract_strided_slice %35 {offsets = [0, 0], sizes = [1, 256], strides = [1, 1]} : vector<4x256xf32> to vector<1x256xf32>
    %38 = vector.broadcast %36 : vector<4x1xf32> to vector<4x256xf32>
    %39 = vector.broadcast %37 : vector<1x256xf32> to vector<4x256xf32>
    %40 = arith.mulf %38, %39 : vector<4x256xf32>
    %41 = vector.extract_strided_slice %2 {offsets = [0, 1], sizes = [4, 1], strides = [1, 1]} : vector<4x4xf32> to vector<4x1xf32>
    %42 = vector.extract_strided_slice %35 {offsets = [1, 0], sizes = [1, 256], strides = [1, 1]} : vector<4x256xf32> to vector<1x256xf32>
    %43 = vector.broadcast %41 : vector<4x1xf32> to vector<4x256xf32>
    %44 = vector.broadcast %42 : vector<1x256xf32> to vector<4x256xf32>
    %45 = arith.mulf %43, %44 : vector<4x256xf32>
    %46 = arith.addf %40, %45 : vector<4x256xf32>
    %47 = vector.extract_strided_slice %2 {offsets = [0, 2], sizes = [4, 1], strides = [1, 1]} : vector<4x4xf32> to vector<4x1xf32>
    %48 = vector.extract_strided_slice %35 {offsets = [2, 0], sizes = [1, 256], strides = [1, 1]} : vector<4x256xf32> to vector<1x256xf32>
    %49 = vector.broadcast %47 : vector<4x1xf32> to vector<4x256xf32>
    %50 = vector.broadcast %48 : vector<1x256xf32> to vector<4x256xf32>
    %51 = arith.mulf %49, %50 : vector<4x256xf32>
    %52 = arith.addf %46, %51 : vector<4x256xf32>
    %53 = vector.extract_strided_slice %2 {offsets = [0, 3], sizes = [4, 1], strides = [1, 1]} : vector<4x4xf32> to vector<4x1xf32>
    %54 = vector.extract_strided_slice %35 {offsets = [3, 0], sizes = [1, 256], strides = [1, 1]} : vector<4x256xf32> to vector<1x256xf32>
    %55 = vector.broadcast %53 : vector<4x1xf32> to vector<4x256xf32>
    %56 = vector.broadcast %54 : vector<1x256xf32> to vector<4x256xf32>
    %57 = arith.mulf %55, %56 : vector<4x256xf32>
    %58 = arith.addf %52, %57 : vector<4x256xf32>
    %59 = vector.broadcast %3 : vector<4x1xf32> to vector<4x256xf32>
    %60 = arith.addf %58, %59 : vector<4x256xf32>
    %cst_11 = arith.constant 0.000000e+00 : f32
    %61 = vector.broadcast %cst_11 : f32 to vector<4x256xf32>
    %62 = arith.cmpf ogt, %60, %61 : vector<4x256xf32>
    %cst_12 = arith.constant 0.00999999977 : f32
    %63 = vector.broadcast %cst_12 : f32 to vector<4x256xf32>
    %64 = arith.mulf %63, %60 : vector<4x256xf32>
    %65 = arith.select %62, %60, %64 : vector<4x256xi1>, vector<4x256xf32>
    %66 = arith.addf %65, %5 : vector<4x256xf32>
    %c0_13 = arith.constant 0 : index
    %c0_14 = arith.constant 0 : index
    %c0_15 = arith.constant 0 : index
    %67 = vector.load %arg7[%c0_13, %c0_14, %c0_15] : memref<1x4x256xf32, #tpu.memory_space<vmem>>, vector<1x4x256xf32>
    %68 = vector.shape_cast %67 : vector<1x4x256xf32> to vector<4x256xf32>
    %69 = vector.shape_cast %66 : vector<4x256xf32> to vector<1x4x256xf32>
    tpu.vector_store %arg7[%c0_13, %c0_14, %c0_15], %69 {strides = array<i32>} : memref<1x4x256xf32, #tpu.memory_space<vmem>>, vector<1x4x256xf32>,
    return
  }
  func.func @transform_0(%arg0: i32, %arg1: i32) -> (i32, i32, i32) {
    %c0_i32 = arith.constant 0 : i32
    %c0_i32_0 = arith.constant 0 : i32
    return %arg0, %c0_i32, %arg1 : i32, i32, i32
  }
  func.func @transform_1(%arg0: i32, %arg1: i32) -> (i32, i32) {
    %c0_i32 = arith.constant 0 : i32
    %c0_i32_0 = arith.constant 0 : i32
    %c0_i32_1 = arith.constant 0 : i32
    return %c0_i32, %c0_i32_0 : i32, i32
  }
  func.func @transform_2(%arg0: i32, %arg1: i32) -> (i32, i32) {
    %c0_i32 = arith.constant 0 : i32
    %c0_i32_0 = arith.constant 0 : i32
    %c0_i32_1 = arith.constant 0 : i32
    return %c0_i32, %c0_i32_0 : i32, i32
  }
  func.func @transform_3(%arg0: i32, %arg1: i32) -> (i32, i32) {
    %c0_i32 = arith.constant 0 : i32
    %c0_i32_0 = arith.constant 0 : i32
    %c0_i32_1 = arith.constant 0 : i32
    return %c0_i32, %c0_i32_0 : i32, i32
  }
  func.func @transform_4(%arg0: i32, %arg1: i32) -> (i32, i32) {
    %c0_i32 = arith.constant 0 : i32
    %c0_i32_0 = arith.constant 0 : i32
    %c0_i32_1 = arith.constant 0 : i32
    return %c0_i32, %c0_i32_0 : i32, i32
  }
  func.func @transform_5(%arg0: i32, %arg1: i32) -> (i32, i32, i32) {
    %c0_i32 = arith.constant 0 : i32
    %c0_i32_0 = arith.constant 0 : i32
    return %arg0, %c0_i32, %arg1 : i32, i32, i32
  }
}

</mosaic_0001>

<bundles_post_ra>
// kernel: tpu_custom_call.1
= control target key start
LH: loop header
LB: loop body
LE: loop exit
PB: predicated region body
PF: predicated region fallthrough
CT: control target
= control target key end

     0   :  { %10 = vsyncpa [#allocation3], 0  ;;  %s1046_s0 = inlined_call_operand.hbm [shape: f32[2,4,256], index: 0, kind: input, shape index: {}]   ;;  %s1047_s1 = inlined_call_operand.vmem [shape: f32[4,4], index: 1, kind: input, shape index: {}]   ;;  %s1048_s2 = inlined_call_operand.vmem [shape: f32[4,1], index: 2, kind: input, shape index: {}]   ;;  %s1049_s3 = inlined_call_operand.vmem [shape: f32[4,4], index: 3, kind: input, shape index: {}]   ;;  %s1050_s4 = inlined_call_operand.vmem [shape: f32[4,1], index: 4, kind: input, shape index: {}]   ;;  %s1051_s5 = inlined_call_operand.hbm [shape: f32[2,4,256], index: 5, kind: output, shape index: {}]  }
   0x1   :  { %12 = vsyncpa [#allocation3 + $0x1], 0 }
   0x2   :  { %13 = vsyncpa [#allocation4], 0 }
   0x3   :  { %15 = vsyncpa [#allocation4 + $0x1], 0  ;;  %s814_s18 = smov 0   ;;  %s816_s19 = smov 0  }
   0x4   :  { %s818_s20 = smov 0   ;;  %s820_s21 = smov 0  }
   0x5   :  { %s822_s22 = smov 0   ;;  %s824_s23 = smov 0  }
   0x6 LB: > { %s569_s24 = sadd.s32 4294967295, %s776_s23   ;;  %s570_s25 = sadd.s32 4294967294, %s776_s23   ;;  %s776_s23 = sphi %s824_s23, %s21_s23   ;;  %s772_s22 = sphi %s822_s22, %s1067_s22   ;;  %s768_s21 = sphi %s820_s21, %s1066_s21   ;;  %s764_s20 = sphi %s818_s20, %s1065_s20   ;;  %s760_s19 = sphi %s816_s19, %s1064_s19   ;;  %s756_s18 = sphi %s814_s18, %s1063_s18  }
   0x7   : > { %s33_s26 = sadd.s32 1, %s772_s22  ;;  %s42_s27 = sadd.s32 1, %s764_s20 }
   0x8   : > { %p35_p0 = scmp.ge.s32.totalorder %s33_s26, 2  ;;  %p49_p1 = scmp.ne.s32.totalorder %s764_s20, %s760_s19 }
   0x9   : > { %p50_p2 = scmp.eq.s32.totalorder %s776_s23, 0  ;;  %p55_p3 = scmp.ne.s32.totalorder %s760_s19, %s756_s18 }
   0xa   : > { %s1069_s26 = smov (%p35_p0, %s33_s26), 0  ;;  %p56_p5 = scmp.eq.s32.totalorder %s569_s24, 0 }
   0xb   : > { %p855_p4 = por %p50_p2, %p49_p1  ;;  %s37_s29 = ssub.s32 %s772_s22, %s1069_s26 }
   0xc   : > { %p165_p6 = scmp.eq.s32.totalorder %s569_s24, 1  ;;  %p40_p7 = scmp.eq.s32.totalorder %s37_s29, 0 }
   0xd   : > { %p861_p8 = por %p56_p5, %p55_p3  ;;  %p171_p10 = scmp.eq.s32.totalorder %s570_s25, 1 }
   0xe   : > { %p865_p9 = por %p165_p6, %p49_p1  ;;  %p598_p13 = scmp.lt.s32.totalorder %s776_s23, 2 }
   0xf   : > { %s870_s7 = scalar_select %p40_p7, %s764_s20, %s42_s27  }
  0x10   : > { %s1055_s6 = scalar_select %p865_p9, 1, 0 }
  0x11   : > { %p872_p11 = por %p171_p10, %p55_p3  ;;  %s203_s9 = sand.u32 1, %s764_s20  }
  0x12   : > { %s573_s10 = sshll.u32 %s203_s9, 3  ;;  %s584_s11 = sshll.u32 %s772_s22, 7 }
  0x13   : > { %s1056_s8 = scalar_select %p872_p11, 1, 0 }
  0x14   : > { %s883_s14 = scalar_lea.hbm %s1046_s0, %s584_s11  ;;  %s207_s15 = scalar_lea.vmem [#allocation2], %s573_s10 }
  0x15   : > { %s217_s16 = sshll.u32 %s207_s15, 4  ;;  %p889_p0 = pnand %p598_p13, %p855_p4  ;;  %s885_s16 = int_to_ptr.vmem [resolvable:$true] %s217_s16 }
  0x16   : > { %s204_s24 = scalar_lea.sflag [#allocation3], %s203_s9  ;;  %s664_s25 = scalar_lea.hbm %s883_s14, 128 }
  0x17   : > { %p665_p3 = scmp.ne.s32.totalorder %s883_s14, %s664_s25  ;;  %p666_p5 = pneg %p889_p0 }
  0x18   : > { %s669_s28 = scalar_lea.hbm %s1046_s0, 256  ;;  %p670_p4 = scmp.lt.u32.totalorder %s883_s14, %s1046_s0 }
  0x19   : > { %p667_p6 = pnand %p666_p5, %p665_p3  ;;  %p671_p10 = scmp.lt.u32.totalorder %s669_s28, %s664_s25 }
  0x1a   : > { %p673_p12 = scmp.lt.u32.totalorder %s664_s25, %s883_s14 }
  0x1b   : > { %p668_p7 = pneg %p667_p6  ;;  %p672_p13 = por %p671_p10, %p670_p4 }
  0x1d   : > { %p674_p1 = por %p673_p12, %p672_p13 }
  0x1f   : > { %p675_p2 = pnand %p674_p1, %p668_p7 }
  0x21   : > { %678 = shalt.err (!%p675_p2)
}
  0x22   : > { %s679_s9 = scalar_lea.vmem %s885_s16, 128  ;;  %s778_s12 = smov [#allocation2]  }
  0x23   : > { %p680_p3 = scmp.ne.s32.totalorder %s885_s16, %s679_s9  ;;  %s684_s13 = sshll.u32 %s778_s12, 4  ;;  %s685_s13 = int_to_ptr.vmem [resolvable:$false] %s684_s13 }
  0x24   : > { %s686_s15 = scalar_lea.vmem %s685_s13, 256  ;;  %p687_p9 = scmp.lt.s32.totalorder %s885_s16, %s685_s13 }
  0x25   : > { %p682_p6 = pnand %p680_p3, %p666_p5  ;;  %p688_p4 = scmp.lt.s32.totalorder %s686_s15, %s679_s9 }
  0x27   : > { %p683_p11 = pneg %p682_p6  ;;  %p689_p10 = por %p688_p4, %p687_p9 }
  0x29   : > { %p690_p12 = pnand %p689_p10, %p683_p11 }
  0x2b   : > { %693 = shalt.err (!%p690_p12)
}
  0x2c   : > { %593 = dma.hbm_to_vmem [thread:$0]  (!%p889_p0), %s883_s14, 128, %s885_s16, %s204_s24  }
  0x2d   : > { %p1058_p1 = scmp.lt.s32.totalorder %s776_s23, 3  ;;  %p1059_p2 = scmp.ge.s32.totalorder %s776_s23, 1 }
  0x2f   : > { %p223_p5 = pnand %p1059_p2, %p1058_p1 }
  0x30   : > { %s925_s25 = sand.u32 (!%p223_p5), 1, %s760_s19  }
  0x31   : > { %226 = sbr.rel (%p223_p5) target bundleno = 238 (0xee), region = 40  ;;  %s577_s27 = sshll.u32 (!%p223_p5), %s925_s25, 3 }
  0x32   : > { %s229_s29 = scalar_lea.sflag (!%p223_p5), [#allocation3], %s925_s25  ;;  %s931_s17 = scalar_lea.vmem (!%p223_p5), [#allocation2], %s577_s27 }
  0x38   : > { %747 = dma.done.wait (%p861_p8), %s229_s29, 128  }
  0x39   : > { %749 = vsyncadd (%p861_p8), %s229_s29, 4294967168  ;;  %v779_v0 = vmov 2   ;;  %v780_v1 = vmov 0   ;;  %v261_v2 = vld [vmem:[%s1047_s1] sm:$0xf]  ;;  %v781_v3 = vmov 3   ;;  %v272_v8 = vlaneseq }
  0x3a   : > { %654 = vset.pattern.permute.xlu1 %v779_v0  ;;  %652 = vset.pattern.permute.xlu0 %v780_v1  ;;  %v782_v4 = vmov 1   ;;  %v262_v5 = vld [vmem:[%s1048_s2] sm:$0xf]  ;;  %s585_s12 = sshll.u32 %s768_s21, 7  ;;  %s258_s13 = scalar_lea.vmem [#allocation5], %s577_s27 }
  0x3b   : > { %319 = vperm.xlu1 %654, %v261_v2   ;;  %268 = vperm.xlu0 %652, %v261_v2   ;;  %v263_v6 = vld [vmem:[%s1049_s3] sm:$0xf]  ;;  %v273_v9 = vshrl.u32 %v272_v8, 7  ;;  %s485_s15 = sshll.u32 %s258_s13, 4  ;;  %s997_s14 = scalar_lea.hbm %s1051_s5, %s585_s12  ;;  %s999_s15 = int_to_ptr.vmem [resolvable:$true] %s485_s15 }
  0x3c   : > { %v264_v7 = vld [vmem:[%s1050_s4] sm:$0xf]  ;;  %s469_s16 = scalar_lea.sflag [#allocation4], %s925_s25  ;;  %s694_s21 = scalar_lea.vmem %s999_s15, 128 }
  0x3d   : > { %v949_v10 = vsub.s32 0, %v273_v9  ;;  %v278_v11 = vsub.s32 4, %v273_v9  ;;  %v951_v12 = vsub.s32 1, %v273_v9  ;;  %v302_v13 = vsub.s32 5, %v273_v9  ;;  %v954_v14 = vld [vmem:[%s931_s17] sm:$0xff]  ;;  %p695_p8 = scmp.ne.s32.totalorder %s999_s15, %s694_s21  ;;  %p1060_p9 = scmp.ne.s32.totalorder %s1055_s6, 0 }
  0x3e   : > { %v956_v15 = vsub.s32 2, %v273_v9  ;;  %v328_v16 = vsub.s32 6, %v273_v9  ;;  %v958_v17 = vsub.s32 3, %v273_v9  ;;  %v354_v18 = vsub.s32 7, %v273_v9  ;;  %s783_s27 = smov [#allocation5]  }
  0x3f   : > { %655 = vset.pattern.permute.xlu1 %v781_v3  ;;  %653 = vset.pattern.permute.xlu0 %v782_v4  ;;  %v275_v19 = vrot.slane %v954_v14, %v949_v10  ;;  %v279_v20 = vrot.slane %v954_v14, %v278_v11  ;;  %v299_v21 = vrot.slane %v954_v14, %v951_v12  ;;  %p696_p11 = pnand %p695_p8, %p1060_p9  ;;  %s698_s24 = sshll.u32 %s783_s27, 4  ;;  %s699_s24 = int_to_ptr.vmem [resolvable:$false] %s698_s24 }
  0x40   : > { %345 = vperm.xlu1 %655, %v261_v2   ;;  %293 = vperm.xlu0 %653, %v261_v2   ;;  %v303_v22 = vrot.slane %v954_v14, %v302_v13  ;;  %v325_v24 = vrot.slane %v954_v14, %v956_v15  ;;  %v329_v25 = vrot.slane %v954_v14, %v328_v16  ;;  %s700_s28 = scalar_lea.vmem %s699_s24, 256  ;;  %p701_p7 = scmp.lt.s32.totalorder %s999_s15, %s699_s24 }
  0x41   : > { %v351_v27 = vrot.slane %v954_v14, %v958_v17  ;;  %v355_v28 = vrot.slane %v954_v14, %v354_v18  ;;  %v285_v29 = vrot.slane %v275_v19, %v949_v10  ;;  %v289_v30 = vrot.slane %v279_v20, %v949_v10  ;;  %p697_p0 = pneg %p696_p11  ;;  %p702_p13 = scmp.lt.s32.totalorder %s700_s28, %s694_s21 }
  0x42   : > { %v309_v31 = vrot.slane %v299_v21, %v951_v12  ;;  %v313_v32 = vrot.slane %v303_v22, %v951_v12  ;;  %v335_v33 = vrot.slane %v325_v24, %v956_v15  ;;  %v339_v34 = vrot.slane %v329_v25, %v956_v15 }
  0x43   : > { %v361_v36 = vrot.slane %v351_v27, %v958_v17  ;;  %v365_v37 = vrot.slane %v355_v28, %v958_v17  ;;  %p703_p3 = por %p702_p13, %p701_p7 }
  0x44   : > { %656 = vset.pattern.permute.xlu1 %v780_v1  ;;  %657 = vset.pattern.permute.xlu0 %v780_v1 }
  0x45   : > { %372 = vperm.xlu1 %656, %v262_v5   ;;  %385 = vperm.xlu0 %657, %v263_v6   ;;  %p704_p6 = pnand %p703_p3, %p697_p0 }
  0x49   : > { %658 = vset.pattern.permute.xlu1 %v782_v4  ;;  %660 = vset.pattern.permute.xlu0 %v781_v3 }
  0x4a   : > { %399 = vperm.xlu1 %658, %v263_v6   ;;  %431 = vperm.xlu0 %660, %v263_v6  }
  0x4e   : > { %659 = vset.pattern.permute.xlu1 %v779_v0  ;;  %662 = vset.pattern.permute.xlu0 %v780_v1 }
  0x4f   : > { %415 = vperm.xlu1 %659, %v263_v6  }
  0x53   : > { %661 = vset.pattern.permute.xlu1 %v780_v1 }
  0x54   : > { %448 = vperm.xlu1 %661, %v264_v7  }
  0xba   : > { %v269_v23 = vpop.permute.xlu0 %268  ;;  %v320_v26 = vpop.permute.xlu1 %319 }
  0xbb   : > { %v290_v39 = vmul.f32 %v285_v29, %v269_v23  ;;  %v291_v40 = vmul.f32 %v289_v30, %v269_v23  ;;  %v340_v43 = vmul.f32 %v335_v33, %v320_v26  ;;  %v341_v44 = vmul.f32 %v339_v34, %v320_v26 }
  0xbc   : > { %v459_v26 = vcombine.high %v954_v14, %v954_v14 }
  0xbf   : > { %v294_v35 = vpop.permute.xlu0 %293  ;;  %v346_v38 = vpop.permute.xlu1 %345 }
  0xc0   : > { %v314_v41 = vmul.f32 %v309_v31, %v294_v35  ;;  %v315_v42 = vmul.f32 %v313_v32, %v294_v35  ;;  %v366_v47 = vmul.f32 %v361_v36, %v346_v38  ;;  %v367_v48 = vmul.f32 %v365_v37, %v346_v38 }
  0xc2   : > { %v316_v45 = vadd.f32 %v314_v41, %v290_v39  ;;  %v317_v46 = vadd.f32 %v315_v42, %v291_v40 }
  0xc4   : > { %v373_v49 = vpop.permute.xlu1 %372  ;;  %v342_v50 = vadd.f32 %v340_v43, %v316_v45  ;;  %v343_v51 = vadd.f32 %v341_v44, %v317_v46  ;;  %v386_v59 = vpop.permute.xlu0 %385 }
  0xc6   : > { %v368_v52 = vadd.f32 %v366_v47, %v342_v50  ;;  %v369_v53 = vadd.f32 %v367_v48, %v343_v51 }
  0xc8   : > { %v375_v54 = vadd.f32 %v373_v49, %v368_v52  ;;  %v376_v55 = vadd.f32 %v373_v49, %v369_v53 }
  0xc9   : > { %v400_v56 = vpop.permute.xlu1 %399  ;;  %v432_v13 = vpop.permute.xlu0 %431 }
  0xca   : > { %vm377_vm0 = vcmp.gt.f32.partialorder %v375_v54, 0.0  ;;  %vm378_vm1 = vcmp.gt.f32.partialorder %v376_v55, 0.0  ;;  %v379_v57 = vmul.f32 0.01, %v375_v54  ;;  %v380_v58 = vmul.f32 0.01, %v376_v55 }
  0xcc   : > { %v381_v60 = vsel %vm377_vm0, %v375_v54, %v379_v57  ;;  %v382_v61 = vsel %vm378_vm1, %v376_v55, %v380_v58 }
  0xcd   : > { %v405_v62 = vrot.slane %v381_v60, %v951_v12  ;;  %v409_v63 = vrot.slane %v382_v61, %v951_v12  ;;  %v391_v0 = vrot.slane %v381_v60, %v949_v10  ;;  %v395_v1 = vrot.slane %v382_v61, %v949_v10 }
  0xce   : > { %v416_v2 = vpop.permute.xlu1 %415  ;;  %v421_v3 = vrot.slane %v381_v60, %v956_v15  ;;  %v425_v4 = vrot.slane %v382_v61, %v956_v15  ;;  %v437_v5 = vrot.slane %v381_v60, %v958_v17  ;;  %v441_v6 = vrot.slane %v382_v61, %v958_v17 }
  0xcf   : > { %v410_v7 = vmul.f32 %v405_v62, %v400_v56  ;;  %v411_v8 = vmul.f32 %v409_v63, %v400_v56  ;;  %v396_v9 = vmul.f32 %v391_v0, %v386_v59  ;;  %v397_v11 = vmul.f32 %v395_v1, %v386_v59 }
  0xd0   : > { %v426_v18 = vmul.f32 %v421_v3, %v416_v2  ;;  %v427_v19 = vmul.f32 %v425_v4, %v416_v2  ;;  %v442_v21 = vmul.f32 %v437_v5, %v432_v13  ;;  %v443_v22 = vmul.f32 %v441_v6, %v432_v13 }
  0xd1   : > { %v412_v16 = vadd.f32 %v410_v7, %v396_v9  ;;  %v413_v12 = vadd.f32 %v411_v8, %v397_v11 }
  0xd3   : > { %v428_v20 = vadd.f32 %v426_v18, %v412_v16  ;;  %v429_v10 = vadd.f32 %v427_v19, %v413_v12  ;;  %v449_v15 = vpop.permute.xlu1 %448 }
  0xd5   : > { %v444_v23 = vadd.f32 %v442_v21, %v428_v20  ;;  %v445_v24 = vadd.f32 %v443_v22, %v429_v10 }
  0xd7   : > { %v451_v25 = vadd.f32 %v449_v15, %v444_v23  ;;  %v452_v17 = vadd.f32 %v449_v15, %v445_v24 }
  0xd9   : > { %vm453_vm2 = vcmp.gt.f32.partialorder %v451_v25, 0.0  ;;  %vm454_vm3 = vcmp.gt.f32.partialorder %v452_v17, 0.0  ;;  %v455_v27 = vmul.f32 0.01, %v451_v25  ;;  %v456_v28 = vmul.f32 0.01, %v452_v17 }
  0xdb   : > { %v457_v29 = vsel %vm453_vm2, %v451_v25, %v455_v27  ;;  %v458_v30 = vsel %vm454_vm3, %v452_v17, %v456_v28 }
  0xdc   : > { %v461_v31 = vadd.f32 %v457_v29, %v954_v14  ;;  %v462_v32 = vadd.f32 %v459_v26, %v458_v30 }
  0xde   : > { %v465_v33 = vcombine.low %v461_v31, %v462_v32 }
  0xe0   : > { %467 = vst [vmem:[%s258_s13] sm:$0xff] %v465_v33 }
  0xe1   : > { %707 = shalt.err (!%p704_p6)
}
  0xe2   : > { %s708_s25 = scalar_lea.hbm %s997_s14, 128  ;;  %s712_s11 = scalar_lea.hbm %s1051_s5, 256 }
  0xe3   : > { %p709_p4 = scmp.ne.s32.totalorder %s997_s14, %s708_s25  ;;  %p713_p1 = scmp.lt.u32.totalorder %s997_s14, %s1051_s5 }
  0xe4   : > { %p714_p2 = scmp.lt.u32.totalorder %s712_s11, %s708_s25  ;;  %p716_p8 = scmp.lt.u32.totalorder %s708_s25, %s997_s14 }
  0xe5   : > { %p710_p10 = pnand %p709_p4, %p1060_p9 }
  0xe6   : > { %p715_p5 = por %p714_p2, %p713_p1 }
  0xe7   : > { %p711_p12 = pneg %p710_p10 }
  0xe8   : > { %p717_p11 = por %p716_p8, %p715_p5 }
  0xea   : > { %p718_p0 = pnand %p717_p11, %p711_p12 }
  0xec   : > { %721 = shalt.err (!%p718_p0)
}
  0xed   : > { %588 = dma.vmem_to_hbm [thread:$0]  (%p1060_p9), %s999_s15, 128, %s997_s14, %s469_s16  }
  0xee PF: > { %s497_s13 = sand.u32 1, %s756_s18   ;;  %p1061_p7 = scmp.ne.s32.totalorder %s1056_s8, 0 }
  0xef   : > { %p1062_p13 = scmp.ge.s32.totalorder %s776_s23, 2  ;;  %s498_s29 = scalar_lea.sflag [#allocation4], %s497_s13 }
  0xf1   : > { %p595_p3 = pnand %p1062_p13, %p1061_p7 }
  0xf3   : > { %751 = dma.done.wait (!%p595_p3), %s498_s29, 128  }
  0xf4   : > { %753 = vsyncadd (!%p595_p3), %s498_s29, 4294967168  ;;  %s21_s23 = sadd.s32 1, %s776_s23   ;;  %s1063_s18 = smov %s760_s19 }
  0xf5   : > { %p18_p6 = scmp.ge.s32.totalorder %s21_s23, 4   ;;  %s1064_s19 = smov %s764_s20 }
  0xf6   : > { %s1065_s20 = smov %s870_s7  ;;  %s1066_s21 = smov %s772_s22 }
  0xf7   : > { %s1067_s22 = smov %s1069_s26  ;;  %20 = sbr.rel (!%p18_p6) target bundleno = 6 (0x6), region = 85 }
  0xfe   :  { %503 = vsyncpa [#allocation3], 1 }
  0xff   :  { %505 = vsyncpa [#allocation3 + $0x1], 1 }
 0x100   :  { %506 = vsyncpa [#allocation4], 1 }
 0x101   :  { %508 = vsyncpa [#allocation4 + $0x1], 1 }

</bundles_post_ra>
